<compile_context>
chip_gen: v6e
topology: v6e:2x2x1
jax: 0.10.0
libtpu: 0.0.40
codegen_flags: <defaults>
</compile_context>

<pallas_src>
import functools
import math

import jax
import jax.numpy as jnp
from jax import lax
from jax.experimental import pallas as pl
from jax.experimental.pallas import tpu as pltpu

NUM_HEADS = 4
D_MODEL = 32
HEAD_DIM = D_MODEL // NUM_HEADS
SEQ = 16
BATCH = 2


def mha_kernel(q_ref, k_ref, v_ref, w_ref, b_ref, o_ref, *,
               batch, seq, num_heads, head_dim):
    """Whole (batch-folded) problem in one invocation, channel-major layout.

    q/k/v: (B, D, N) f32      w: (4, D, D)  [wq, wk, wv, wm], pre-permuted
    b:     (4, D, 1)          o: (B, D, N) f32
    """
    B, N, H, dh = batch, seq, num_heads, head_dim

    # Fold batch along lanes: (B, D, N) -> (D, B*N).  No transposes needed.
    def fold(ref):
        return jnp.concatenate([ref[b] for b in range(B)], axis=1)

    xq, xk, xv = fold(q_ref), fold(k_ref), fold(v_ref)

    # Three fused projections (one matmul each): (D, D) @ (D, B*N).
    # Head h owns rows h*dh:(h+1)*dh (permutation done at parameter prep);
    # 1/sqrt(dh) is folded into w[0]/b[0].
    qp = jnp.dot(w_ref[0], xq, preferred_element_type=jnp.float32) + b_ref[0]
    kp = jnp.dot(w_ref[1], xk, preferred_element_type=jnp.float32) + b_ref[1]
    vp = jnp.dot(w_ref[2], xv, preferred_element_type=jnp.float32) + b_ref[2]

    # One square (32,32) XLU transpose puts q in rows form so every matmul
    # below is a plain A@B or A@B^T MXU form (no transposed-LHS contraction).
    qp_rows = qp.T                                     # (B*N, D)

    # Per-(batch, head) score matmuls, stacked along sublanes so the softmax
    # runs once over all B*H score matrices.
    scores = []
    for b in range(B):                                 # static unroll (B = 2)
        cs = slice(b * N, (b + 1) * N)
        for h in range(H):                             # static unroll (H = 4)
            hs = slice(h * dh, (h + 1) * dh)
            scores.append(jnp.dot(qp_rows[cs, hs], kp[hs, cs],
                                  preferred_element_type=jnp.float32))  # (N, N)
    s = jnp.concatenate(scores, axis=0)                # (B*H*N, N)

    # Single batched softmax (exact reciprocal; trivial cost at this size).
    s = s - jnp.max(s, axis=-1, keepdims=True)
    e = jnp.exp(s)
    prob = e * pl.reciprocal(jnp.sum(e, axis=-1, keepdims=True), approx=False)

    # PV per (batch, head) in A@B^T form; heads concatenated along sublanes,
    # batches along lanes -> a single fused merge matmul handles everything.
    o_cols = []
    for b in range(B):
        cs = slice(b * N, (b + 1) * N)
        o_heads = []
        for h in range(H):
            hs = slice(h * dh, (h + 1) * dh)
            p_bh = prob[(b * H + h) * N:(b * H + h + 1) * N, :]         # (N, N)
            o_heads.append(lax.dot_general(
                vp[hs, cs], p_bh, (((1,), (1,)), ((), ())),
                preferred_element_type=jnp.float32))                    # (dh, N)
        o_cols.append(jnp.concatenate(o_heads, axis=0))                 # (D, N)
    o_all = jnp.concatenate(o_cols, axis=1)                             # (D, B*N)

    out = jnp.dot(w_ref[3], o_all, preferred_element_type=jnp.float32) + b_ref[3]

    # Store directly in the caller's (B, d_model, N) layout.
    for b in range(B):
        o_ref[b] = out[:, b * N:(b + 1) * N].astype(o_ref.dtype)


def prepare_params(params):
    """One-time weight re-layout (parameter-load time, not the hot path).

    PyTorch's `.view(B, dim, H, N)` maps conv output channel c -> (d, h) with
    c = d*H + h, so head h owns channels h::H.  We permute so head h owns a
    CONTIGUOUS row block h*dh:(h+1)*dh, fuse all heads into one (D, D) weight
    per projection, fold 1/sqrt(dh) into wq/bq, and permute the merge conv's
    INPUT channels to match.  Everything is packed into two tensors.
    """
    H, dh = NUM_HEADS, HEAD_DIM
    scale = 1.0 / math.sqrt(dh)
    # perm[h*dh + d] = d*H + h  (new head-contiguous channel -> original channel)
    perm = jnp.arange(D_MODEL).reshape(dh, H).T.reshape(-1)

    def proj_cm(w, b, s=1.0):
        w2 = w[:, :, 0] * s                 # (D_out, D_in), row = orig out chan
        return w2[perm, :], (b * s)[perm]   # rows reordered to h*dh + d

    wq, bq = proj_cm(params['wq'], params['bq'], scale)
    wk, bk = proj_cm(params['wk'], params['bk'])
    wv, bv = proj_cm(params['wv'], params['bv'])

    # Merge conv: reorder INPUT channels (columns) to h*dh + d; outputs as-is.
    wm = params['wm'][:, :, 0][:, perm]     # (D_out, D_in_reordered)
    bm = params['bm']

    return {
        'w': jnp.stack([wq, wk, wv, wm]),                   # (4, D, D)
        'b': jnp.stack([bq, bk, bv, bm])[:, :, None],       # (4, D, 1)
    }


@jax.jit
def multi_headed_attention(q_ncw, k_ncw, v_ncw, prep):
    """Inputs/outputs in PyTorch Conv1d layout (B, d_model, N); no wrapper-side
    layout ops at all -- everything happens inside one pallas_call."""
    B, D, N = q_ncw.shape
    H, dh = NUM_HEADS, HEAD_DIM

    def full_spec(shape):                   # whole array as a single block
        return pl.BlockSpec(shape, lambda i, _s=shape: (0,) * len(_s))

    kernel = functools.partial(mha_kernel, batch=B, seq=N,
                               num_heads=H, head_dim=dh)

    flops = 4 * 2 * D * D * B * N + 2 * 2 * B * H * N * N * dh
    bytes_accessed = (4 * B * D * N + 4 * D * D + 4 * D) * 4
    cost = pl.CostEstimate(flops=flops,
                           transcendentals=B * H * N * N,
                           bytes_accessed=bytes_accessed)

    return pl.pallas_call(
        kernel,
        out_shape=jax.ShapeDtypeStruct((B, D, N), jnp.float32),
        grid=(1,),   # whole problem in one step: launch/latency dominated here
        in_specs=[
            full_spec((B, D, N)),
            full_spec((B, D, N)),
            full_spec((B, D, N)),
            full_spec((4, D, D)),
            full_spec((4, D, 1)),
        ],
        out_specs=full_spec((B, D, N)),
        compiler_params=pltpu.CompilerParams(
            dimension_semantics=("arbitrary",)),
        cost_estimate=cost,
    )(q_ncw, k_ncw, v_ncw, prep['w'], prep['b'])


def reference(q, k, v, params):
    """Pure-JAX mirror of the PyTorch forward (NCW layout)."""
    def conv1d(x, w, b):
        return jnp.einsum('oi,bin->bon', w[:, :, 0], x) + b[None, :, None]

    B = q.shape[0]
    qp = conv1d(q, params['wq'], params['bq']).reshape(B, HEAD_DIM, NUM_HEADS, -1)
    kp = conv1d(k, params['wk'], params['bk']).reshape(B, HEAD_DIM, NUM_HEADS, -1)
    vp = conv1d(v, params['wv'], params['bv']).reshape(B, HEAD_DIM, NUM_HEADS, -1)
    scores = jnp.einsum('bdhn,bdhm->bhnm', qp, kp) / (HEAD_DIM ** 0.5)
    prob = jax.nn.softmax(scores, axis=-1)
    x = jnp.einsum('bhnm,bdhm->bdhn', prob, vp)
    x = x.reshape(B, D_MODEL, -1)
    return conv1d(x, params['wm'], params['bm'])


if __name__ == "__main__":
    key = jax.random.PRNGKey(0)
    keys = jax.random.split(key, 11)

    # Deterministic synthetic parameters (Conv1d(d_model, d_model, 1) x4).
    params = {
        'wq': 0.1 * jax.random.normal(keys[0], (D_MODEL, D_MODEL, 1), jnp.float32),
        'bq': 0.1 * jax.random.normal(keys[1], (D_MODEL,), jnp.float32),
        'wk': 0.1 * jax.random.normal(keys[2], (D_MODEL, D_MODEL, 1), jnp.float32),
        'bk': 0.1 * jax.random.normal(keys[3], (D_MODEL,), jnp.float32),
        'wv': 0.1 * jax.random.normal(keys[4], (D_MODEL, D_MODEL, 1), jnp.float32),
        'bv': 0.1 * jax.random.normal(keys[5], (D_MODEL,), jnp.float32),
        'wm': 0.1 * jax.random.normal(keys[6], (D_MODEL, D_MODEL, 1), jnp.float32),
        'bm': 0.1 * jax.random.normal(keys[7], (D_MODEL,), jnp.float32),
    }

    # Inputs in PyTorch Conv1d layout (B, d_model, N).
    q = jax.random.normal(keys[8], (BATCH, D_MODEL, SEQ), jnp.float32)
    k = jax.random.normal(keys[9], (BATCH, D_MODEL, SEQ), jnp.float32)
    v = jax.random.normal(keys[10], (BATCH, D_MODEL, SEQ), jnp.float32)

    prep = prepare_params(params)   # one-time weight re-layout

    out = jax.block_until_ready(multi_headed_attention(q, k, v, prep))
    ref = jax.block_until_ready(reference(q, k, v, params))

    assert out.shape == (BATCH, D_MODEL, SEQ)
    err = float(jnp.max(jnp.abs(out - ref)))
    assert jnp.allclose(out, ref, atol=2e-3, rtol=2e-3), f"max err {err}"
    print("KERNEL_OK")
</pallas_src>

<mosaic_0001>
module attributes {stable_mosaic.version = 11 : i64} {
  func.func @mha_kernel(%arg0: i32, %arg1: memref<2x32x16xf32, #tpu.memory_space<vmem>>, %arg2: memref<2x32x16xf32, #tpu.memory_space<vmem>>, %arg3: memref<2x32x16xf32, #tpu.memory_space<vmem>>, %arg4: memref<4x32x32xf32, #tpu.memory_space<vmem>>, %arg5: memref<4x32x1xf32, #tpu.memory_space<vmem>>, %arg6: memref<2x32x16xf32, #tpu.memory_space<vmem>>) attributes {dimension_semantics = [#tpu.dimension_semantics<arbitrary>], iteration_bounds = array<i64: 1>, scalar_prefetch = 0 : i64, scratch_operands = 0 : i64, tpu.core_type = #tpu.core_type<tc>, window_params = [{pipeline_mode = #tpu.pipeline_mode<synchronous>, transform_indices = @transform_0, window_bounds = array<i64: 2, 32, 16>}, {pipeline_mode = #tpu.pipeline_mode<synchronous>, transform_indices = @transform_1, window_bounds = array<i64: 2, 32, 16>}, {pipeline_mode = #tpu.pipeline_mode<synchronous>, transform_indices = @transform_2, window_bounds = array<i64: 2, 32, 16>}, {pipeline_mode = #tpu.pipeline_mode<synchronous>, transform_indices = @transform_3, window_bounds = array<i64: 4, 32, 32>}, {pipeline_mode = #tpu.pipeline_mode<synchronous>, transform_indices = @transform_4, window_bounds = array<i64: 4, 32, 1>}, {pipeline_mode = #tpu.pipeline_mode<synchronous>, transform_indices = @transform_5, window_bounds = array<i64: 2, 32, 16>}]} {
    %c0 = arith.constant 0 : index
    %c0_0 = arith.constant 0 : index
    %c0_1 = arith.constant 0 : index
    %0 = vector.load %arg1[%c0, %c0_0, %c0_1] : memref<2x32x16xf32, #tpu.memory_space<vmem>>, vector<1x32x16xf32>
    %1 = vector.shape_cast %0 : vector<1x32x16xf32> to vector<32x16xf32>
    %c1 = arith.constant 1 : index
    %c0_2 = arith.constant 0 : index
    %c0_3 = arith.constant 0 : index
    %2 = vector.load %arg1[%c1, %c0_2, %c0_3] : memref<2x32x16xf32, #tpu.memory_space<vmem>>, vector<1x32x16xf32>
    %3 = vector.shape_cast %2 : vector<1x32x16xf32> to vector<32x16xf32>
    %4 = tpu.concatenate %1, %3 in 1 : vector<32x16xf32>, vector<32x16xf32> -> vector<32x32xf32>
    %c0_4 = arith.constant 0 : index
    %c0_5 = arith.constant 0 : index
    %c0_6 = arith.constant 0 : index
    %5 = vector.load %arg2[%c0_4, %c0_5, %c0_6] : memref<2x32x16xf32, #tpu.memory_space<vmem>>, vector<1x32x16xf32>
    %6 = vector.shape_cast %5 : vector<1x32x16xf32> to vector<32x16xf32>
    %c1_7 = arith.constant 1 : index
    %c0_8 = arith.constant 0 : index
    %c0_9 = arith.constant 0 : index
    %7 = vector.load %arg2[%c1_7, %c0_8, %c0_9] : memref<2x32x16xf32, #tpu.memory_space<vmem>>, vector<1x32x16xf32>
    %8 = vector.shape_cast %7 : vector<1x32x16xf32> to vector<32x16xf32>
    %9 = tpu.concatenate %6, %8 in 1 : vector<32x16xf32>, vector<32x16xf32> -> vector<32x32xf32>
    %c0_10 = arith.constant 0 : index
    %c0_11 = arith.constant 0 : index
    %c0_12 = arith.constant 0 : index
    %10 = vector.load %arg3[%c0_10, %c0_11, %c0_12] : memref<2x32x16xf32, #tpu.memory_space<vmem>>, vector<1x32x16xf32>
    %11 = vector.shape_cast %10 : vector<1x32x16xf32> to vector<32x16xf32>
    %c1_13 = arith.constant 1 : index
    %c0_14 = arith.constant 0 : index
    %c0_15 = arith.constant 0 : index
    %12 = vector.load %arg3[%c1_13, %c0_14, %c0_15] : memref<2x32x16xf32, #tpu.memory_space<vmem>>, vector<1x32x16xf32>
    %13 = vector.shape_cast %12 : vector<1x32x16xf32> to vector<32x16xf32>
    %14 = tpu.concatenate %11, %13 in 1 : vector<32x16xf32>, vector<32x16xf32> -> vector<32x32xf32>
    %c0_16 = arith.constant 0 : index
    %c0_17 = arith.constant 0 : index
    %c0_18 = arith.constant 0 : index
    %15 = vector.load %arg4[%c0_16, %c0_17, %c0_18] : memref<4x32x32xf32, #tpu.memory_space<vmem>>, vector<1x32x32xf32>
    %16 = vector.shape_cast %15 : vector<1x32x32xf32> to vector<32x32xf32>
    %cst = arith.constant dense<0.000000e+00> : vector<32x32xf32>
    %17 = tpu.matmul %16, %4, %cst {dimension_numbers = #tpu.dot_dimension_numbers<[1], [0], [0], [1], [0, 0, 1, 1], [], []>} : vector<32x32xf32>, vector<32x32xf32>, vector<32x32xf32> -> vector<32x32xf32>
    %c0_19 = arith.constant 0 : index
    %c0_20 = arith.constant 0 : index
    %c0_21 = arith.constant 0 : index
    %18 = vector.load %arg5[%c0_19, %c0_20, %c0_21] : memref<4x32x1xf32, #tpu.memory_space<vmem>>, vector<1x32x1xf32>
    %19 = vector.shape_cast %18 : vector<1x32x1xf32> to vector<32x1xf32>
    %20 = vector.broadcast %19 : vector<32x1xf32> to vector<32x32xf32>
    %21 = arith.addf %17, %20 : vector<32x32xf32>
    %c1_22 = arith.constant 1 : index
    %c0_23 = arith.constant 0 : index
    %c0_24 = arith.constant 0 : index
    %22 = vector.load %arg4[%c1_22, %c0_23, %c0_24] : memref<4x32x32xf32, #tpu.memory_space<vmem>>, vector<1x32x32xf32>
    %23 = vector.shape_cast %22 : vector<1x32x32xf32> to vector<32x32xf32>
    %cst_25 = arith.constant dense<0.000000e+00> : vector<32x32xf32>
    %24 = tpu.matmul %23, %9, %cst_25 {dimension_numbers = #tpu.dot_dimension_numbers<[1], [0], [0], [1], [0, 0, 1, 1], [], []>} : vector<32x32xf32>, vector<32x32xf32>, vector<32x32xf32> -> vector<32x32xf32>
    %c1_26 = arith.constant 1 : index
    %c0_27 = arith.constant 0 : index
    %c0_28 = arith.constant 0 : index
    %25 = vector.load %arg5[%c1_26, %c0_27, %c0_28] : memref<4x32x1xf32, #tpu.memory_space<vmem>>, vector<1x32x1xf32>
    %26 = vector.shape_cast %25 : vector<1x32x1xf32> to vector<32x1xf32>
    %27 = vector.broadcast %26 : vector<32x1xf32> to vector<32x32xf32>
    %28 = arith.addf %24, %27 : vector<32x32xf32>
    %c2 = arith.constant 2 : index
    %c0_29 = arith.constant 0 : index
    %c0_30 = arith.constant 0 : index
    %29 = vector.load %arg4[%c2, %c0_29, %c0_30] : memref<4x32x32xf32, #tpu.memory_space<vmem>>, vector<1x32x32xf32>
    %30 = vector.shape_cast %29 : vector<1x32x32xf32> to vector<32x32xf32>
    %cst_31 = arith.constant dense<0.000000e+00> : vector<32x32xf32>
    %31 = tpu.matmul %30, %14, %cst_31 {dimension_numbers = #tpu.dot_dimension_numbers<[1], [0], [0], [1], [0, 0, 1, 1], [], []>} : vector<32x32xf32>, vector<32x32xf32>, vector<32x32xf32> -> vector<32x32xf32>
    %c2_32 = arith.constant 2 : index
    %c0_33 = arith.constant 0 : index
    %c0_34 = arith.constant 0 : index
    %32 = vector.load %arg5[%c2_32, %c0_33, %c0_34] : memref<4x32x1xf32, #tpu.memory_space<vmem>>, vector<1x32x1xf32>
    %33 = vector.shape_cast %32 : vector<1x32x1xf32> to vector<32x1xf32>
    %34 = vector.broadcast %33 : vector<32x1xf32> to vector<32x32xf32>
    %35 = arith.addf %31, %34 : vector<32x32xf32>
    %36 = tpu.transpose %21, [1, 0] : vector<32x32xf32> -> vector<32x32xf32>
    %37 = vector.extract_strided_slice %36 {offsets = [0, 0], sizes = [16, 8], strides = [1, 1]} : vector<32x32xf32> to vector<16x8xf32>
    %38 = vector.extract_strided_slice %28 {offsets = [0, 0], sizes = [8, 16], strides = [1, 1]} : vector<32x32xf32> to vector<8x16xf32>
    %cst_35 = arith.constant dense<0.000000e+00> : vector<16x16xf32>
    %39 = tpu.matmul %37, %38, %cst_35 {dimension_numbers = #tpu.dot_dimension_numbers<[1], [0], [0], [1], [0, 0, 1, 1], [], []>} : vector<16x8xf32>, vector<8x16xf32>, vector<16x16xf32> -> vector<16x16xf32>
    %40 = vector.extract_strided_slice %36 {offsets = [0, 8], sizes = [16, 8], strides = [1, 1]} : vector<32x32xf32> to vector<16x8xf32>
    %41 = vector.extract_strided_slice %28 {offsets = [8, 0], sizes = [8, 16], strides = [1, 1]} : vector<32x32xf32> to vector<8x16xf32>
    %cst_36 = arith.constant dense<0.000000e+00> : vector<16x16xf32>
    %42 = tpu.matmul %40, %41, %cst_36 {dimension_numbers = #tpu.dot_dimension_numbers<[1], [0], [0], [1], [0, 0, 1, 1], [], []>} : vector<16x8xf32>, vector<8x16xf32>, vector<16x16xf32> -> vector<16x16xf32>
    %43 = vector.extract_strided_slice %36 {offsets = [0, 16], sizes = [16, 8], strides = [1, 1]} : vector<32x32xf32> to vector<16x8xf32>
    %44 = vector.extract_strided_slice %28 {offsets = [16, 0], sizes = [8, 16], strides = [1, 1]} : vector<32x32xf32> to vector<8x16xf32>
    %cst_37 = arith.constant dense<0.000000e+00> : vector<16x16xf32>
    %45 = tpu.matmul %43, %44, %cst_37 {dimension_numbers = #tpu.dot_dimension_numbers<[1], [0], [0], [1], [0, 0, 1, 1], [], []>} : vector<16x8xf32>, vector<8x16xf32>, vector<16x16xf32> -> vector<16x16xf32>
    %46 = vector.extract_strided_slice %36 {offsets = [0, 24], sizes = [16, 8], strides = [1, 1]} : vector<32x32xf32> to vector<16x8xf32>
    %47 = vector.extract_strided_slice %28 {offsets = [24, 0], sizes = [8, 16], strides = [1, 1]} : vector<32x32xf32> to vector<8x16xf32>
    %cst_38 = arith.constant dense<0.000000e+00> : vector<16x16xf32>
    %48 = tpu.matmul %46, %47, %cst_38 {dimension_numbers = #tpu.dot_dimension_numbers<[1], [0], [0], [1], [0, 0, 1, 1], [], []>} : vector<16x8xf32>, vector<8x16xf32>, vector<16x16xf32> -> vector<16x16xf32>
    %49 = vector.extract_strided_slice %36 {offsets = [16, 0], sizes = [16, 8], strides = [1, 1]} : vector<32x32xf32> to vector<16x8xf32>
    %50 = vector.extract_strided_slice %28 {offsets = [0, 16], sizes = [8, 16], strides = [1, 1]} : vector<32x32xf32> to vector<8x16xf32>
    %cst_39 = arith.constant dense<0.000000e+00> : vector<16x16xf32>
    %51 = tpu.matmul %49, %50, %cst_39 {dimension_numbers = #tpu.dot_dimension_numbers<[1], [0], [0], [1], [0, 0, 1, 1], [], []>} : vector<16x8xf32>, vector<8x16xf32>, vector<16x16xf32> -> vector<16x16xf32>
    %52 = vector.extract_strided_slice %36 {offsets = [16, 8], sizes = [16, 8], strides = [1, 1]} : vector<32x32xf32> to vector<16x8xf32>
    %53 = vector.extract_strided_slice %28 {offsets = [8, 16], sizes = [8, 16], strides = [1, 1]} : vector<32x32xf32> to vector<8x16xf32>
    %cst_40 = arith.constant dense<0.000000e+00> : vector<16x16xf32>
    %54 = tpu.matmul %52, %53, %cst_40 {dimension_numbers = #tpu.dot_dimension_numbers<[1], [0], [0], [1], [0, 0, 1, 1], [], []>} : vector<16x8xf32>, vector<8x16xf32>, vector<16x16xf32> -> vector<16x16xf32>
    %55 = vector.extract_strided_slice %36 {offsets = [16, 16], sizes = [16, 8], strides = [1, 1]} : vector<32x32xf32> to vector<16x8xf32>
    %56 = vector.extract_strided_slice %28 {offsets = [16, 16], sizes = [8, 16], strides = [1, 1]} : vector<32x32xf32> to vector<8x16xf32>
    %cst_41 = arith.constant dense<0.000000e+00> : vector<16x16xf32>
    %57 = tpu.matmul %55, %56, %cst_41 {dimension_numbers = #tpu.dot_dimension_numbers<[1], [0], [0], [1], [0, 0, 1, 1], [], []>} : vector<16x8xf32>, vector<8x16xf32>, vector<16x16xf32> -> vector<16x16xf32>
    %58 = vector.extract_strided_slice %36 {offsets = [16, 24], sizes = [16, 8], strides = [1, 1]} : vector<32x32xf32> to vector<16x8xf32>
    %59 = vector.extract_strided_slice %28 {offsets = [24, 16], sizes = [8, 16], strides = [1, 1]} : vector<32x32xf32> to vector<8x16xf32>
    %cst_42 = arith.constant dense<0.000000e+00> : vector<16x16xf32>
    %60 = tpu.matmul %58, %59, %cst_42 {dimension_numbers = #tpu.dot_dimension_numbers<[1], [0], [0], [1], [0, 0, 1, 1], [], []>} : vector<16x8xf32>, vector<8x16xf32>, vector<16x16xf32> -> vector<16x16xf32>
    %61 = tpu.concatenate %39, %42, %45, %48, %51, %54, %57, %60 in 0 : vector<16x16xf32>, vector<16x16xf32>, vector<16x16xf32>, vector<16x16xf32>, vector<16x16xf32>, vector<16x16xf32>, vector<16x16xf32>, vector<16x16xf32> -> vector<128x16xf32>
    %cst_43 = arith.constant dense<0xFF800000> : vector<128xf32>
    %62 = vector.multi_reduction <maximumf>, %61, %cst_43 [1] : vector<128x16xf32> to vector<128xf32>
    %63 = vector.shape_cast %62 : vector<128xf32> to vector<128x1xf32>
    %64 = vector.broadcast %63 : vector<128x1xf32> to vector<128x16xf32>
    %65 = arith.subf %61, %64 : vector<128x16xf32>
    %66 = math.exp %65 : vector<128x16xf32>
    %cst_44 = arith.constant dense<0.000000e+00> : vector<128xf32>
    %67 = vector.multi_reduction <add>, %66, %cst_44 [1] : vector<128x16xf32> to vector<128xf32>
    %68 = vector.shape_cast %67 : vector<128xf32> to vector<128x1xf32>
    %69 = tpu.reciprocal %68 : vector<128x1xf32> -> vector<128x1xf32>
    %70 = vector.broadcast %69 : vector<128x1xf32> to vector<128x16xf32>
    %71 = arith.mulf %66, %70 : vector<128x16xf32>
    %72 = vector.extract_strided_slice %71 {offsets = [0, 0], sizes = [16, 16], strides = [1, 1]} : vector<128x16xf32> to vector<16x16xf32>
    %73 = vector.extract_strided_slice %35 {offsets = [0, 0], sizes = [8, 16], strides = [1, 1]} : vector<32x32xf32> to vector<8x16xf32>
    %cst_45 = arith.constant dense<0.000000e+00> : vector<8x16xf32>
    %74 = tpu.matmul %73, %72, %cst_45 {dimension_numbers = #tpu.dot_dimension_numbers<[1], [1], [0], [0], [0, 0, 1, 0], [], []>} : vector<8x16xf32>, vector<16x16xf32>, vector<8x16xf32> -> vector<8x16xf32>
    %75 = vector.extract_strided_slice %71 {offsets = [16, 0], sizes = [16, 16], strides = [1, 1]} : vector<128x16xf32> to vector<16x16xf32>
    %76 = vector.extract_strided_slice %35 {offsets = [8, 0], sizes = [8, 16], strides = [1, 1]} : vector<32x32xf32> to vector<8x16xf32>
    %cst_46 = arith.constant dense<0.000000e+00> : vector<8x16xf32>
    %77 = tpu.matmul %76, %75, %cst_46 {dimension_numbers = #tpu.dot_dimension_numbers<[1], [1], [0], [0], [0, 0, 1, 0], [], []>} : vector<8x16xf32>, vector<16x16xf32>, vector<8x16xf32> -> vector<8x16xf32>
    %78 = vector.extract_strided_slice %71 {offsets = [32, 0], sizes = [16, 16], strides = [1, 1]} : vector<128x16xf32> to vector<16x16xf32>
    %79 = vector.extract_strided_slice %35 {offsets = [16, 0], sizes = [8, 16], strides = [1, 1]} : vector<32x32xf32> to vector<8x16xf32>
    %cst_47 = arith.constant dense<0.000000e+00> : vector<8x16xf32>
    %80 = tpu.matmul %79, %78, %cst_47 {dimension_numbers = #tpu.dot_dimension_numbers<[1], [1], [0], [0], [0, 0, 1, 0], [], []>} : vector<8x16xf32>, vector<16x16xf32>, vector<8x16xf32> -> vector<8x16xf32>
    %81 = vector.extract_strided_slice %71 {offsets = [48, 0], sizes = [16, 16], strides = [1, 1]} : vector<128x16xf32> to vector<16x16xf32>
    %82 = vector.extract_strided_slice %35 {offsets = [24, 0], sizes = [8, 16], strides = [1, 1]} : vector<32x32xf32> to vector<8x16xf32>
    %cst_48 = arith.constant dense<0.000000e+00> : vector<8x16xf32>
    %83 = tpu.matmul %82, %81, %cst_48 {dimension_numbers = #tpu.dot_dimension_numbers<[1], [1], [0], [0], [0, 0, 1, 0], [], []>} : vector<8x16xf32>, vector<16x16xf32>, vector<8x16xf32> -> vector<8x16xf32>
    %84 = tpu.concatenate %74, %77, %80, %83 in 0 : vector<8x16xf32>, vector<8x16xf32>, vector<8x16xf32>, vector<8x16xf32> -> vector<32x16xf32>
    %85 = vector.extract_strided_slice %71 {offsets = [64, 0], sizes = [16, 16], strides = [1, 1]} : vector<128x16xf32> to vector<16x16xf32>
    %86 = vector.extract_strided_slice %35 {offsets = [0, 16], sizes = [8, 16], strides = [1, 1]} : vector<32x32xf32> to vector<8x16xf32>
    %cst_49 = arith.constant dense<0.000000e+00> : vector<8x16xf32>
    %87 = tpu.matmul %86, %85, %cst_49 {dimension_numbers = #tpu.dot_dimension_numbers<[1], [1], [0], [0], [0, 0, 1, 0], [], []>} : vector<8x16xf32>, vector<16x16xf32>, vector<8x16xf32> -> vector<8x16xf32>
    %88 = vector.extract_strided_slice %71 {offsets = [80, 0], sizes = [16, 16], strides = [1, 1]} : vector<128x16xf32> to vector<16x16xf32>
    %89 = vector.extract_strided_slice %35 {offsets = [8, 16], sizes = [8, 16], strides = [1, 1]} : vector<32x32xf32> to vector<8x16xf32>
    %cst_50 = arith.constant dense<0.000000e+00> : vector<8x16xf32>
    %90 = tpu.matmul %89, %88, %cst_50 {dimension_numbers = #tpu.dot_dimension_numbers<[1], [1], [0], [0], [0, 0, 1, 0], [], []>} : vector<8x16xf32>, vector<16x16xf32>, vector<8x16xf32> -> vector<8x16xf32>
    %91 = vector.extract_strided_slice %71 {offsets = [96, 0], sizes = [16, 16], strides = [1, 1]} : vector<128x16xf32> to vector<16x16xf32>
    %92 = vector.extract_strided_slice %35 {offsets = [16, 16], sizes = [8, 16], strides = [1, 1]} : vector<32x32xf32> to vector<8x16xf32>
    %cst_51 = arith.constant dense<0.000000e+00> : vector<8x16xf32>
    %93 = tpu.matmul %92, %91, %cst_51 {dimension_numbers = #tpu.dot_dimension_numbers<[1], [1], [0], [0], [0, 0, 1, 0], [], []>} : vector<8x16xf32>, vector<16x16xf32>, vector<8x16xf32> -> vector<8x16xf32>
    %94 = vector.extract_strided_slice %71 {offsets = [112, 0], sizes = [16, 16], strides = [1, 1]} : vector<128x16xf32> to vector<16x16xf32>
    %95 = vector.extract_strided_slice %35 {offsets = [24, 16], sizes = [8, 16], strides = [1, 1]} : vector<32x32xf32> to vector<8x16xf32>
    %cst_52 = arith.constant dense<0.000000e+00> : vector<8x16xf32>
    %96 = tpu.matmul %95, %94, %cst_52 {dimension_numbers = #tpu.dot_dimension_numbers<[1], [1], [0], [0], [0, 0, 1, 0], [], []>} : vector<8x16xf32>, vector<16x16xf32>, vector<8x16xf32> -> vector<8x16xf32>
    %97 = tpu.concatenate %87, %90, %93, %96 in 0 : vector<8x16xf32>, vector<8x16xf32>, vector<8x16xf32>, vector<8x16xf32> -> vector<32x16xf32>
    %98 = tpu.concatenate %84, %97 in 1 : vector<32x16xf32>, vector<32x16xf32> -> vector<32x32xf32>
    %c3 = arith.constant 3 : index
    %c0_53 = arith.constant 0 : index
    %c0_54 = arith.constant 0 : index
    %99 = vector.load %arg4[%c3, %c0_53, %c0_54] : memref<4x32x32xf32, #tpu.memory_space<vmem>>, vector<1x32x32xf32>
    %100 = vector.shape_cast %99 : vector<1x32x32xf32> to vector<32x32xf32>
    %cst_55 = arith.constant dense<0.000000e+00> : vector<32x32xf32>
    %101 = tpu.matmul %100, %98, %cst_55 {dimension_numbers = #tpu.dot_dimension_numbers<[1], [0], [0], [1], [0, 0, 1, 1], [], []>} : vector<32x32xf32>, vector<32x32xf32>, vector<32x32xf32> -> vector<32x32xf32>
    %c3_56 = arith.constant 3 : index
    %c0_57 = arith.constant 0 : index
    %c0_58 = arith.constant 0 : index
    %102 = vector.load %arg5[%c3_56, %c0_57, %c0_58] : memref<4x32x1xf32, #tpu.memory_space<vmem>>, vector<1x32x1xf32>
    %103 = vector.shape_cast %102 : vector<1x32x1xf32> to vector<32x1xf32>
    %104 = vector.broadcast %103 : vector<32x1xf32> to vector<32x32xf32>
    %105 = arith.addf %101, %104 : vector<32x32xf32>
    %106 = vector.extract_strided_slice %105 {offsets = [0, 0], sizes = [32, 16], strides = [1, 1]} : vector<32x32xf32> to vector<32x16xf32>
    %c0_59 = arith.constant 0 : index
    %c0_60 = arith.constant 0 : index
    %c0_61 = arith.constant 0 : index
    %107 = vector.load %arg6[%c0_59, %c0_60, %c0_61] : memref<2x32x16xf32, #tpu.memory_space<vmem>>, vector<1x32x16xf32>
    %108 = vector.shape_cast %107 : vector<1x32x16xf32> to vector<32x16xf32>
    %109 = vector.shape_cast %106 : vector<32x16xf32> to vector<1x32x16xf32>
    tpu.vector_store %arg6[%c0_59, %c0_60, %c0_61], %109 {strides = array<i32>} : memref<2x32x16xf32, #tpu.memory_space<vmem>>, vector<1x32x16xf32>,
    %110 = vector.extract_strided_slice %105 {offsets = [0, 16], sizes = [32, 16], strides = [1, 1]} : vector<32x32xf32> to vector<32x16xf32>
    %c1_62 = arith.constant 1 : index
    %c0_63 = arith.constant 0 : index
    %c0_64 = arith.constant 0 : index
    %111 = vector.load %arg6[%c1_62, %c0_63, %c0_64] : memref<2x32x16xf32, #tpu.memory_space<vmem>>, vector<1x32x16xf32>
    %112 = vector.shape_cast %111 : vector<1x32x16xf32> to vector<32x16xf32>
    %113 = vector.shape_cast %110 : vector<32x16xf32> to vector<1x32x16xf32>
    tpu.vector_store %arg6[%c1_62, %c0_63, %c0_64], %113 {strides = array<i32>} : memref<2x32x16xf32, #tpu.memory_space<vmem>>, vector<1x32x16xf32>,
    return
  }
  func.func @transform_0(%arg0: i32) -> (i32, i32, i32) {
    %c0_i32 = arith.constant 0 : i32
    %c0_i32_0 = arith.constant 0 : i32
    %c0_i32_1 = arith.constant 0 : i32
    %c0_i32_2 = arith.constant 0 : i32
    return %c0_i32, %c0_i32_0, %c0_i32_1 : i32, i32, i32
  }
  func.func @transform_1(%arg0: i32) -> (i32, i32, i32) {
    %c0_i32 = arith.constant 0 : i32
    %c0_i32_0 = arith.constant 0 : i32
    %c0_i32_1 = arith.constant 0 : i32
    %c0_i32_2 = arith.constant 0 : i32
    return %c0_i32, %c0_i32_0, %c0_i32_1 : i32, i32, i32
  }
  func.func @transform_2(%arg0: i32) -> (i32, i32, i32) {
    %c0_i32 = arith.constant 0 : i32
    %c0_i32_0 = arith.constant 0 : i32
    %c0_i32_1 = arith.constant 0 : i32
    %c0_i32_2 = arith.constant 0 : i32
    return %c0_i32, %c0_i32_0, %c0_i32_1 : i32, i32, i32
  }
  func.func @transform_3(%arg0: i32) -> (i32, i32, i32) {
    %c0_i32 = arith.constant 0 : i32
    %c0_i32_0 = arith.constant 0 : i32
    %c0_i32_1 = arith.constant 0 : i32
    %c0_i32_2 = arith.constant 0 : i32
    return %c0_i32, %c0_i32_0, %c0_i32_1 : i32, i32, i32
  }
  func.func @transform_4(%arg0: i32) -> (i32, i32, i32) {
    %c0_i32 = arith.constant 0 : i32
    %c0_i32_0 = arith.constant 0 : i32
    %c0_i32_1 = arith.constant 0 : i32
    %c0_i32_2 = arith.constant 0 : i32
    return %c0_i32, %c0_i32_0, %c0_i32_1 : i32, i32, i32
  }
  func.func @transform_5(%arg0: i32) -> (i32, i32, i32) {
    %c0_i32 = arith.constant 0 : i32
    %c0_i32_0 = arith.constant 0 : i32
    %c0_i32_1 = arith.constant 0 : i32
    %c0_i32_2 = arith.constant 0 : i32
    return %c0_i32, %c0_i32_0, %c0_i32_1 : i32, i32, i32
  }
}

</mosaic_0001>

<bundles_post_ra>
// kernel: multi_headed_attention.1
= control target key start
LH: loop header
LB: loop body
LE: loop exit
PB: predicated region body
PF: predicated region fallthrough
CT: control target
= control target key end

     0   :  { %s2586_s22 = smov 16   ;;  %vm136_vm0 = vcmask 261120   ;;  %v2587_v9 = vmov 0   ;;  %vm45_vm1 = vcmask 130048   ;;  %vm520_vm2 = vcmask 64512   ;;  %s2589_s7 = smov 120   ;;  %s3135_s0 = inlined_call_operand.vmem [shape: f32[2,32,16], index: 0, kind: input, shape index: {}]   ;;  %s3136_s3 = inlined_call_operand.vmem [shape: f32[4,32,32], index: 3, kind: input, shape index: {}]   ;;  %s3137_s1 = inlined_call_operand.vmem [shape: f32[2,32,16], index: 1, kind: input, shape index: {}]   ;;  %s3138_s4 = inlined_call_operand.vmem [shape: f32[4,32,1], index: 4, kind: input, shape index: {}]   ;;  %s3139_s2 = inlined_call_operand.vmem [shape: f32[2,32,16], index: 2, kind: input, shape index: {}]   ;;  %s3140_s5 = inlined_call_operand.vmem [shape: f32[2,32,16], index: 5, kind: output, shape index: {}]  }
   0x1   :  { %v2188_v0 = vld [vmem:[%s3135_s0 + $0x38] sm:$0xff]  ;;  %v2186_v1 = vld [vmem:[%s3135_s0 + $0x28] sm:$0xff]  ;;  %v2187_v2 = vld [vmem:[%s3135_s0 + $0x30] sm:$0xff]  ;;  %2520 = vset.pattern.permute.xlu0 %v2587_v9  ;;  %2521 = vset.pattern.permute.xlu1 %v2587_v9  ;;  %s2590_s8 = smov 104   ;;  %vm2592_vm3 = vmmov 0  }
   0x2   :  { %39 = vrot.lane.b32.xlu0 %v2188_v0, %s2586_s22  ;;  %35 = vrot.lane.b32.xlu1 %v2186_v1, %s2586_s22  ;;  %v2185_v3 = vld [vmem:[%s3135_s0 + $0x20] sm:$0xff]  ;;  %v2192_v5 = vld [vmem:[%s3137_s1 + $0x38] sm:$0xff] }
   0x3   :  { %v108_v4 = vld [vmem:[%s3136_s3] sm:$0xff]  ;;  %v2191_v6 = vld [vmem:[%s3137_s1 + $0x30] sm:$0xff]  ;;  %v2190_v7 = vld [vmem:[%s3137_s1 + $0x28] sm:$0xff] }
   0x4   :  { %2369 = vmatprep.mubr.msk.f32.mxu1 %vm136_vm0, %v108_v4  ;;  %v2189_v8 = vld [vmem:[%s3137_s1 + $0x20] sm:$0xff]  ;;  %v113_v11 = vld [vmem:[%s3138_s4 + $0x8] sm:$0xff]  ;;  %v115_v12 = vld [vmem:[%s3138_s4 + $0x18] sm:$0xff] }
   0x5   :  { %v112_v10 = vld [vmem:[%s3138_s4] sm:$0xff]  ;;  %v114_v13 = vld [vmem:[%s3138_s4 + $0x10] sm:$0xff]  ;;  %v2206_v15 = vld [vmem:[%s3138_s4 + $0x28] sm:$0xff] }
   0x6   :  { %37 = vrot.lane.b32.xlu0 %v2187_v2, %s2586_s22  ;;  %33 = vrot.lane.b32.xlu1 %v2185_v3, %s2586_s22  ;;  %v2205_v14 = vld [vmem:[%s3138_s4 + $0x20] sm:$0xff]  ;;  %v2207_v16 = vld [vmem:[%s3138_s4 + $0x30] sm:$0xff] }
   0x7   :  { %v2208_v17 = vld [vmem:[%s3138_s4 + $0x38] sm:$0xff]  ;;  %v2195_v19 = vld [vmem:[%s3139_s2 + $0x30] sm:$0xff]  ;;  %v2194_v20 = vld [vmem:[%s3139_s2 + $0x28] sm:$0xff] }
   0x8   :  { %v2196_v18 = vld [vmem:[%s3139_s2 + $0x38] sm:$0xff]  ;;  %v2193_v21 = vld [vmem:[%s3139_s2 + $0x20] sm:$0xff]  ;;  %v22_v26 = vld [vmem:[%s3135_s0 + $0x10] sm:$0xff] }
   0x9   :  { %v23_v22 = vld [vmem:[%s3135_s0 + $0x18] sm:$0xff]  ;;  %v21_v29 = vld [vmem:[%s3135_s0 + $0x8] sm:$0xff]  ;;  %v20_v30 = vld [vmem:[%s3135_s0] sm:$0xff] }
   0xa   :  { %69 = vrot.lane.b32.xlu0 %v2192_v5, %s2586_s22  ;;  %67 = vrot.lane.b32.xlu1 %v2191_v6, %s2586_s22  ;;  %v53_v32 = vld [vmem:[%s3137_s1 + $0x18] sm:$0xff]  ;;  %v52_v37 = vld [vmem:[%s3137_s1 + $0x10] sm:$0xff] }
   0xb   :  { %v109_v38 = vld [vmem:[%s3136_s3 + $0x8] sm:$0xff]  ;;  %v110_v40 = vld [vmem:[%s3136_s3 + $0x10] sm:$0xff]  ;;  %v50_v45 = vld [vmem:[%s3137_s1] sm:$0xff] }
   0xc   :  { %v51_v41 = vld [vmem:[%s3137_s1 + $0x8] sm:$0xff]  ;;  %v111_v46 = vld [vmem:[%s3136_s3 + $0x18] sm:$0xff]  ;;  %v2201_v48 = vld [vmem:[%s3136_s3 + $0x20] sm:$0xff] }
   0xd   :  { %v2202_v50 = vld [vmem:[%s3136_s3 + $0x28] sm:$0xff]  ;;  %v2203_v51 = vld [vmem:[%s3136_s3 + $0x30] sm:$0xff]  ;;  %v2204_v52 = vld [vmem:[%s3136_s3 + $0x38] sm:$0xff] }
   0xe   :  { %65 = vrot.lane.b32.xlu0 %v2190_v7, %s2586_s22  ;;  %63 = vrot.lane.b32.xlu1 %v2189_v8, %s2586_s22  ;;  %v82_v59 = vld [vmem:[%s3139_s2 + $0x18] sm:$0xff]  ;;  %v81_v62 = vld [vmem:[%s3139_s2 + $0x10] sm:$0xff] }
   0xf   :  { %v80_v0 = vld [vmem:[%s3139_s2 + $0x8] sm:$0xff]  ;;  %v79_v3 = vld [vmem:[%s3139_s2] sm:$0xff]  ;;  %s2588_s2 = smov 112  }
  0x10   :  { %v2213_v5 = vld [vmem:[%s3136_s3 + $0x40] sm:$0xff]  ;;  %v2214_v6 = vld [vmem:[%s3136_s3 + $0x48] sm:$0xff] }
  0x11   :  { %2397 = vmatprep.mubr.msk.f32.mxu0 %vm136_vm0, %v2213_v5 }
  0x12   :  { %118 = vperm.xlu0 %2520, %v112_v10   ;;  %123 = vperm.xlu1 %2521, %v113_v11  }
  0x16   :  { %133 = vperm.xlu0 %2520, %v115_v12   ;;  %128 = vperm.xlu1 %2521, %v114_v13  }
  0x1a   :  { %246 = vperm.xlu0 %2520, %v2205_v14   ;;  %251 = vperm.xlu1 %2521, %v2206_v15  }
  0x1e   :  { %256 = vperm.xlu0 %2520, %v2207_v16   ;;  %261 = vperm.xlu1 %2521, %v2208_v17  }
  0x22   :  { %98 = vrot.lane.b32.xlu0 %v2196_v18, %s2586_s22 }
  0x26   :  { %96 = vrot.lane.b32.xlu0 %v2195_v19, %s2586_s22 }
  0x2a   :  { %94 = vrot.lane.b32.xlu0 %v2194_v20, %s2586_s22 }
  0x2e   :  { %92 = vrot.lane.b32.xlu0 %v2193_v21, %s2586_s22 }
  0x74   :  { %v40_v23 = vpop.permute.xlu0 %39  ;;  %v36_v24 = vpop.permute.xlu1 %35 }
  0x75   :  { %v49_v25 = vsel %vm45_vm1, %v23_v22, %v40_v23  ;;  %v47_v33 = vsel %vm45_vm1, %v21_v29, %v36_v24 }
  0x76   :  { %2361 = vmatprep.subr.mxu1 %v49_v25 }
  0x77   :  { %2362 = vmatpush3.msra.mxu1 %v49_v25  ;;  %v2215_v25 = vld [vmem:[%s3136_s3 + $0x50] sm:$0xff] }
  0x78   :  { %v38_v27 = vpop.permute.xlu0 %37  ;;  %v34_v28 = vpop.permute.xlu1 %33 }
  0x79   :  { %v48_v31 = vsel %vm45_vm1, %v22_v26, %v38_v27  ;;  %v46_v34 = vsel %vm45_vm1, %v20_v30, %v34_v28  ;;  %v2216_v26 = vld [vmem:[%s3136_s3 + $0x58] sm:$0xff] }
  0x7a   :  { %2363 = vmatprep.subr.mxu1 %v48_v31 }
  0x7b   :  { %2364 = vmatpush3.msra.mxu1 %v48_v31 }
  0x7c   :  { %2365 = vmatprep.subr.mxu1 %v47_v33  ;;  %v70_v35 = vpop.permute.xlu0 %69  ;;  %v68_v36 = vpop.permute.xlu1 %67 }
  0x7d   :  { %2366 = vmatpush3.msra.mxu1 %v47_v33  ;;  %v78_v39 = vsel %vm45_vm1, %v53_v32, %v70_v35  ;;  %v77_v42 = vsel %vm45_vm1, %v52_v37, %v68_v36 }
  0x7e   :  { %2367 = vmatprep.subr.mxu1 %v46_v34 }
  0x7f   :  { %2368 = vmatpush3.msra.mxu1 %v46_v34 }
  0x80   :  { %2370 = vmatmul.mubr.msk.f32.vlgmr.msra.gmra.mxu1 %vm136_vm0, %v109_v38  ;;  %2375 = vmatprep.subr.mxu1 %v78_v39  ;;  %v66_v43 = vpop.permute.xlu0 %65  ;;  %v64_v44 = vpop.permute.xlu1 %63 }
  0x81   :  { %2376 = vmatpush3.msra.mxu1 %v78_v39  ;;  %2372 = vmatprep.mubr.msk.f32.mxu1 %vm136_vm0, %v110_v40  ;;  %v76_v47 = vsel %vm45_vm1, %v51_v41, %v66_v43  ;;  %v75_v49 = vsel %vm45_vm1, %v50_v45, %v64_v44 }
  0x82   :  { %2377 = vmatprep.subr.mxu1 %v77_v42 }
  0x83   :  { %2378 = vmatpush3.msra.mxu1 %v77_v42 }
  0x84   :  { %2373 = vmatmul.mubr.msk.f32.gmra.mxu1 %vm136_vm0, %v111_v46  ;;  %2379 = vmatprep.subr.mxu1 %v76_v47 }
  0x85   :  { %2380 = vmatpush3.msra.mxu1 %v76_v47  ;;  %2383 = vmatprep.mubr.msk.f32.mxu1 %vm136_vm0, %v2201_v48 }
  0x86   :  { %2381 = vmatprep.subr.mxu1 %v75_v49 }
  0x87   :  { %2382 = vmatpush3.msra.mxu1 %v75_v49 }
  0x88   :  { %2384 = vmatmul.mubr.msk.f32.vlgmr.msra.gmra.mxu1 %vm136_vm0, %v2202_v50 }
  0x89   :  { %2386 = vmatprep.mubr.msk.f32.mxu1 %vm136_vm0, %v2203_v51 }
  0x8c   :  { %2387 = vmatmul.mubr.msk.f32.gmra.mxu1 %vm136_vm0, %v2204_v52 }
  0x8d   :  { %v119_v53 = vpop.permute.xlu0 %118  ;;  %v124_v7 = vpop.permute.xlu1 %123 }
  0x91   :  { %v134_v54 = vpop.permute.xlu0 %133  ;;  %v129_v9 = vpop.permute.xlu1 %128 }
  0x95   :  { %v247_v55 = vpop.permute.xlu0 %246  ;;  %v252_v15 = vpop.permute.xlu1 %251 }
  0x99   :  { %v257_v56 = vpop.permute.xlu0 %256  ;;  %v262_v27 = vpop.permute.xlu1 %261 }
  0x9d   :  { %v99_v57 = vpop.permute.xlu0 %98 }
  0x9e   :  { %v107_v60 = vsel %vm45_vm1, %v82_v59, %v99_v57 }
  0x9f   :  { %2389 = vmatprep.subr.mxu0 %v107_v60 }
  0xa0   :  { %2390 = vmatpush3.msra.mxu0 %v107_v60 }
  0xa1   :  { %v97_v58 = vpop.permute.xlu0 %96 }
  0xa2   :  { %v106_v63 = vsel %vm45_vm1, %v81_v62, %v97_v58 }
  0xa3   :  { %2391 = vmatprep.subr.mxu0 %v106_v63 }
  0xa4   :  { %2392 = vmatpush3.msra.mxu0 %v106_v63 }
  0xa5   :  { %v95_v61 = vpop.permute.xlu0 %94 }
  0xa6   :  { %v105_v1 = vsel %vm45_vm1, %v80_v0, %v95_v61 }
  0xa7   :  { %2393 = vmatprep.subr.mxu0 %v105_v1 }
  0xa8   :  { %2394 = vmatpush3.msra.mxu0 %v105_v1 }
  0xa9   :  { %v93_v2 = vpop.permute.xlu0 %92 }
  0xaa   :  { %v104_v4 = vsel %vm45_vm1, %v79_v3, %v93_v2 }
  0xab   :  { %2395 = vmatprep.subr.mxu0 %v104_v4 }
  0xac   :  { %2396 = vmatpush3.msra.mxu0 %v104_v4 }
  0xad   :  { %2398 = vmatmul.mubr.msk.f32.vlgmr.msra.gmra.mxu0 %vm136_vm0, %v2214_v6 }
  0xae   :  { %2400 = vmatprep.mubr.msk.f32.mxu0 %vm136_vm0, %v2215_v25  ;;  %v2219_v25 = vld [vmem:[%s3138_s4 + $0x50] sm:$0xff] }
  0xb1   :  { %2401 = vmatmul.mubr.msk.f32.gmra.mxu0 %vm136_vm0, %v2216_v26 }
 0x140   :  { %v2371_v8 = vpop.f32.mrf.mxu1 }
 0x141   :  { %v221_v14 = vadd.f32 %v2371_v8, %v124_v7 }
 0x142   :  { %v215_v10 = vpop.f32.mrf.mxu1 }
 0x143   :  { %v216_v11 = vadd.f32 %v215_v10, %v119_v53 }
 0x144   :  { %v2374_v12 = vpop.f32.mrf.mxu1 }
 0x145   :  { %488 = vxpose.xlu1.b32.start [1/4] (short) (narrow) %v216_v11, 32  ;;  %v231_v23 = vadd.f32 %v2374_v12, %v134_v54 }
 0x146   :  { %v225_v13 = vpop.f32.mrf.mxu1 }
 0x147   :  { %v226_v19 = vadd.f32 %v225_v13, %v129_v9 }
 0x148   :  { %v2385_v16 = vpop.f32.mrf.mxu1 }
 0x149   :  { %v348_v17 = vadd.f32 %v2385_v16, %v252_v15  ;;  %489 = vxpose.xlu1.b32.cont [2/4] (short) (narrow) %v221_v14, 32 }
 0x14a   :  { %v342_v18 = vpop.f32.mrf.mxu1 }
 0x14b   :  { %v343_v20 = vadd.f32 %v342_v18, %v247_v55  ;;  %941 = vrot.lane.b32.xlu0 %v348_v17, %s2588_s2 }
 0x14c   :  { %v2388_v21 = vpop.f32.mrf.mxu1 }
 0x14d   :  { %2403 = vmatprep.subr.mxu1 %v343_v20  ;;  %490 = vxpose.xlu1.b32.cont [3/4] (short) (narrow) %v226_v19, 32  ;;  %v358_v32 = vadd.f32 %v2388_v21, %v262_v27  ;;  %v2217_v21 = vld [vmem:[%s3138_s4 + $0x40] sm:$0xff] }
 0x14e   :  { %v352_v22 = vpop.f32.mrf.mxu1  ;;  %2404 = vmatpush3.msra.mxu1 %v343_v20 }
 0x14f   :  { %v353_v24 = vadd.f32 %v352_v22, %v257_v56  ;;  %852 = vrot.lane.b32.xlu0 %v343_v20, %s2588_s2  ;;  %2408 = vmatprep.subr.mxu1 %v348_v17  ;;  %v2218_v22 = vld [vmem:[%s3138_s4 + $0x48] sm:$0xff] }
 0x151   :  { %2413 = vmatprep.subr.mxu0 %v353_v24  ;;  %491 = vxpose.xlu1.b32.end [4/4] (short) (narrow) %v231_v23, 32  ;;  %v2220_v23 = vld [vmem:[%s3138_s4 + $0x58] sm:$0xff] }
 0x152   :  { %2414 = vmatpush3.msra.mxu0 %v353_v24 }
 0x16d   :  { %v2820_v53 = vpop.f32.mrf.mxu0 }
 0x16f   :  { %v2822_v54 = vpop.f32.mrf.mxu0 }
 0x171   :  { %v2826_v56 = vpop.f32.mrf.mxu0 }
 0x173   :  { %v2832_v59 = vpop.f32.mrf.mxu0 }
 0x1bd   :  { %v942_v28 = vpop.permute.xlu0 %941 }
 0x1c1   :  { %v853_v29 = vpop.permute.xlu0 %852  ;;  %v504_v30 = vpop.trf.xlu1 }
 0x1c2   :  { %2405 = vmatprep.mubr.msk.f32.mxu1 %vm520_vm2, %v504_v30  ;;  %2423 = vmatprep.subr.mxu0 %v853_v29 }
 0x1c3   :  { %602 = vrot.lane.b32.xlu0 %v504_v30, %s2589_s7 }
 0x1c5   :  { %v505_v31 = vpop.trf.xlu1 }
 0x1c6   :  { %2406 = vmatmul.mubr.msk.f32.vlgmr.msra.gmra.mxu1 %vm520_vm2, %v505_v31 }
 0x1c7   :  { %768 = vrot.lane.b32.xlu0 %v504_v30, %s2590_s8  ;;  %2409 = vmatpush3.msra.mxu1 %v348_v17 }
 0x1c8   :  { %2418 = vmatprep.subr.mxu1 %v358_v32 }
 0x1c9   :  { %v506_v33 = vpop.trf.xlu1 }
 0x1cb   :  { %685 = vrot.lane.b32.xlu0 %v504_v30, %s2588_s2 }
 0x1cd   :  { %v507_v34 = vpop.trf.xlu1 }
 0x1ce   :  { %938 = vrot.lane.b32.xlu1 %v507_v34, %s2589_s7 }
 0x1cf   :  { %604 = vrot.lane.b32.xlu0 %v505_v31, %s2589_s7 }
 0x1d3   :  { %770 = vrot.lane.b32.xlu0 %v505_v31, %s2590_s8 }
 0x1d7   :  { %687 = vrot.lane.b32.xlu0 %v505_v31, %s2588_s2 }
 0x1db   :  { %936 = vrot.lane.b32.xlu0 %v506_v33, %s2589_s7 }
 0x1df   :  { %1115 = vrot.lane.b32.xlu0 %v358_v32, %s2588_s2 }
 0x1e3   :  { %1110 = vrot.lane.b32.xlu0 %v506_v33, %s2590_s8 }
 0x1e7   :  { %1028 = vrot.lane.b32.xlu0 %v353_v24, %s2588_s2 }
 0x1eb   :  { %1023 = vrot.lane.b32.xlu0 %v506_v33, %s2588_s2 }
 0x1ef   :  { %1112 = vrot.lane.b32.xlu0 %v507_v34, %s2590_s8 }
 0x1f3   :  { %1025 = vrot.lane.b32.xlu0 %v507_v34, %s2588_s2 }
 0x235   :  { %v603_v35 = vpop.permute.xlu0 %602 }
 0x236   :  { %2410 = vmatprep.mubr.msk.f32.mxu1 %vm520_vm2, %v603_v35  ;;  %v2591_v35 = vmov 0.0  }
 0x239   :  { %v769_v36 = vpop.permute.xlu0 %768 }
 0x23d   :  { %v686_v37 = vpop.permute.xlu0 %685 }
 0x23e   :  { %2415 = vmatprep.mubr.msk.f32.mxu0 %vm520_vm2, %v686_v37 }
 0x240   :  { %v939_v41 = vpop.permute.xlu1 %938 }
 0x241   :  { %v605_v38 = vpop.permute.xlu0 %604 }
 0x242   :  { %2411 = vmatmul.mubr.msk.f32.vlgmr.msra.gmra.mxu1 %vm520_vm2, %v605_v38 }
 0x243   :  { %2419 = vmatpush3.msra.mxu1 %v358_v32  ;;  %2420 = vmatprep.mubr.msk.f32.mxu1 %vm520_vm2, %v769_v36 }
 0x244   :  { %2428 = vmatprep.subr.mxu1 %v942_v28 }
 0x245   :  { %v771_v39 = vpop.permute.xlu0 %770 }
 0x246   :  { %2421 = vmatmul.mubr.msk.f32.vlgmr.msra.gmra.mxu1 %vm520_vm2, %v771_v39 }
 0x247   :  { %2429 = vmatpush3.msra.mxu1 %v942_v28 }
 0x249   :  { %v688_v40 = vpop.permute.xlu0 %687 }
 0x24a   :  { %2416 = vmatmul.mubr.msk.f32.vlgmr.msra.gmra.mxu0 %vm520_vm2, %v688_v40 }
 0x24b   :  { %2424 = vmatpush3.msra.mxu0 %v853_v29  ;;  %2425 = vmatprep.mubr.msk.f32.mxu0 %vm520_vm2, %v506_v33 }
 0x24d   :  { %v937_v42 = vpop.permute.xlu0 %936 }
 0x24e   :  { %2426 = vmatmul.mubr.msk.f32.vlgmr.msra.gmra.mxu0 %vm520_vm2, %v507_v34  ;;  %2430 = vmatprep.mubr.msk.f32.mxu1 %vm520_vm2, %v937_v42 }
 0x24f   :  { %2431 = vmatmul.mubr.msk.f32.vlgmr.msra.gmra.mxu1 %vm520_vm2, %v939_v41 }
 0x251   :  { %v1116_v43 = vpop.permute.xlu0 %1115 }
 0x252   :  { %2438 = vmatprep.subr.mxu1 %v1116_v43 }
 0x253   :  { %2439 = vmatpush3.msra.mxu1 %v1116_v43 }
 0x254   :  { %2450 = vmatprep.subr.mxu1 %v2591_v35 }
 0x255   :  { %v1111_v44 = vpop.permute.xlu0 %1110 }
 0x256   :  { %2440 = vmatprep.mubr.msk.f32.mxu1 %vm520_vm2, %v1111_v44 }
 0x259   :  { %v1029_v45 = vpop.permute.xlu0 %1028 }
 0x25a   :  { %2433 = vmatprep.subr.mxu0 %v1029_v45 }
 0x25b   :  { %2434 = vmatpush3.msra.mxu0 %v1029_v45 }
 0x25c   :  { %2443 = vmatprep.subr.mxu0 %v2591_v35 }
 0x25d   :  { %v1024_v46 = vpop.permute.xlu0 %1023 }
 0x25e   :  { %2435 = vmatprep.mubr.msk.f32.mxu0 %vm520_vm2, %v1024_v46 }
 0x261   :  { %v1113_v47 = vpop.permute.xlu0 %1112 }
 0x262   :  { %2441 = vmatmul.mubr.msk.f32.vlgmr.msra.gmra.mxu1 %vm520_vm2, %v1113_v47 }
 0x263   :  { %2454 = vmatprep.mubr.msk.f32.mxu1 %vm2592_vm3, %v2591_v35 }
 0x265   :  { %v1026_v48 = vpop.permute.xlu0 %1025 }
 0x266   :  { %2436 = vmatmul.mubr.msk.f32.vlgmr.msra.gmra.mxu0 %vm520_vm2, %v1026_v48 }
 0x267   :  { %2447 = vmatprep.mubr.msk.f32.mxu0 %vm2592_vm3, %v2591_v35 }
 0x286   :  { %v2815_v49 = vpop.f32.mrf.mxu1 }
 0x287   :  { %v1200_v50 = vsel %vm45_vm1, %v2815_v49, -inf }
 0x288   :  { %v593_v51 = vpop.f32.mrf.mxu1  ;;  %1201 = vmax.xlane.f32.xlu1 %v1200_v50 }
 0x289   :  { %v1197_v52 = vsel %vm45_vm1, %v593_v51, -inf }
 0x28a   :  { %1198 = vmax.xlane.f32.xlu0 %v1197_v52 }
 0x302   :  { %v2824_v55 = vpop.f32.mrf.mxu1 }
 0x303   :  { %v1206_v57 = vsel %vm45_vm1, %v2824_v55, -inf }
 0x304   :  { %v2830_v58 = vpop.f32.mrf.mxu1  ;;  %1207 = vmax.xlane.f32.xlu0 %v1206_v57 }
 0x305   :  { %v1203_v60 = vsel %vm45_vm1, %v2830_v58, -inf }
 0x306   :  { %v2836_v61 = vpop.f32.mrf.mxu1 }
 0x307   :  { %v1218_v63 = vsel %vm45_vm1, %v2836_v61, -inf }
 0x308   :  { %1204 = vmax.xlane.f32.xlu0 %v1203_v60  ;;  %v2844_v1 = vpop.f32.mrf.mxu1 }
 0x309   :  { %v1215_v3 = vsel %vm45_vm1, %v2844_v1, -inf }
 0x30a   :  { %v2838_v62 = vpop.f32.mrf.mxu0 }
 0x30b   :  { %v1212_v0 = vsel %vm45_vm1, %v2838_v62, -inf }
 0x30c   :  { %v2846_v2 = vpop.f32.mrf.mxu0  ;;  %1219 = vmax.xlane.f32.xlu0 %v1218_v63  ;;  %1213 = vmax.xlane.f32.xlu1 %v1212_v0 }
 0x30d   :  { %v1209_v4 = vsel %vm45_vm1, %v2846_v2, -inf }
 0x30e   :  { %v2854_v6 = vpop.f32.mrf.mxu0 }
 0x30f   :  { %v2852_v5 = vpop.f32.mrf.mxu1  ;;  %v1224_v9 = vsel %vm45_vm1, %v2854_v6, -inf }
 0x310   :  { %1216 = vmax.xlane.f32.xlu0 %v1215_v3  ;;  %1210 = vmax.xlane.f32.xlu1 %v1209_v4  ;;  %v1230_v7 = vsel %vm45_vm1, %v2852_v5, -inf  ;;  %v2862_v10 = vpop.f32.mrf.mxu0 }
 0x311   :  { %v2858_v8 = vpop.f32.mrf.mxu1  ;;  %v1221_v12 = vsel %vm45_vm1, %v2862_v10, -inf  ;;  %v1202_v28 = vpop.xlane.xlu1 %1201 }
 0x312   :  { %v1227_v11 = vsel %vm45_vm1, %v2858_v8, -inf  ;;  %v1246_v29 = vsub.f32 %v2815_v49, %v1202_v28 }
 0x313   :  { %v1199_v24 = vpop.xlane.xlu0 %1198 }
 0x314   :  { %1225 = vmax.xlane.f32.xlu1 %v1224_v9  ;;  %1231 = vmax.xlane.f32.xlu0 %v1230_v7  ;;  %v1245_v26 = vsub.f32 %v593_v51, %v1199_v24  ;;  %v1263_v30 = vmul.f32 1.442695, %v1246_v29 }
 0x316   :  { %v1261_v27 = vmul.f32 1.442695, %v1245_v26 }
 0x318   :  { %1222 = vmax.xlane.f32.xlu1 %v1221_v12  ;;  %1228 = vmax.xlane.f32.xlu0 %v1227_v11  ;;  %2522 = vpow2.f32 %v1261_v27 }
 0x319   :  { %2524 = vpow2.f32 %v1263_v30 }
 0x322   :  { %v2868_v13 = vpop.f32.mrf.mxu1 }
 0x323   :  { %v1242_v14 = vsel %vm45_vm1, %v2868_v13, -inf }
 0x324   :  { %1243 = vmax.xlane.f32.xlu0 %v1242_v14  ;;  %v2872_v15 = vpop.f32.mrf.mxu1 }
 0x325   :  { %v1239_v18 = vsel %vm45_vm1, %v2872_v15, -inf  ;;  %v2897_v31 = vpop.eup %2522 }
 0x326   :  { %v2874_v16 = vpop.f32.mrf.mxu0  ;;  %v1293_v32 = vsel %vm45_vm1, %v2897_v31, 0.0  ;;  %v2901_v33 = vpop.eup %2524 }
 0x327   :  { %v1236_v17 = vsel %vm45_vm1, %v2874_v16, -inf  ;;  %v1296_v34 = vsel %vm45_vm1, %v2901_v33, 0.0 }
 0x328   :  { %v2880_v19 = vpop.f32.mrf.mxu0  ;;  %1237 = vmax.xlane.f32.xlu1 %v1236_v17  ;;  %1240 = vmax.xlane.f32.xlu0 %v1239_v18 }
 0x329   :  { %v1233_v20 = vsel %vm45_vm1, %v2880_v19, -inf }
 0x32c   :  { %1234 = vmax.xlane.f32.xlu1 %v1233_v20 }
 0x33d   :  { %373 = vperm.xlu1 %2521, %v2217_v21  }
 0x33e   :  { %378 = vperm.xlu0 %2520, %v2218_v22  }
 0x341   :  { %388 = vperm.xlu1 %2521, %v2220_v23  }
 0x345   :  { %383 = vperm.xlu1 %2521, %v2219_v25  }
 0x35d   :  { %1294 = vadd.xlane.f32.xlu0 %v1293_v32 }
 0x369   :  { %1297 = vadd.xlane.f32.xlu1 %v1296_v34 }
 0x38d   :  { %v1208_v36 = vpop.xlane.xlu0 %1207 }
 0x38e   :  { %v1248_v37 = vsub.f32 %v2824_v55, %v1208_v36 }
 0x390   :  { %v1267_v38 = vmul.f32 1.442695, %v1248_v37 }
 0x391   :  { %v1205_v39 = vpop.xlane.xlu0 %1204 }
 0x392   :  { %2526 = vpow2.f32 %v1267_v38  ;;  %v1247_v40 = vsub.f32 %v2830_v58, %v1205_v39 }
 0x394   :  { %v1265_v41 = vmul.f32 1.442695, %v1247_v40 }
 0x395   :  { %v1220_v42 = vpop.xlane.xlu0 %1219  ;;  %v1214_v43 = vpop.xlane.xlu1 %1213 }
 0x396   :  { %2528 = vpow2.f32 %v1265_v41  ;;  %v1252_v44 = vsub.f32 %v2836_v61, %v1220_v42  ;;  %v1250_v45 = vsub.f32 %v2838_v62, %v1214_v43 }
 0x398   :  { %v1275_v46 = vmul.f32 1.442695, %v1252_v44  ;;  %v1271_v47 = vmul.f32 1.442695, %v1250_v45 }
 0x399   :  { %v1217_v48 = vpop.xlane.xlu0 %1216  ;;  %v1211_v49 = vpop.xlane.xlu1 %1210 }
 0x39a   :  { %2530 = vpow2.f32 %v1275_v46  ;;  %v1251_v50 = vsub.f32 %v2844_v1, %v1217_v48  ;;  %v1249_v51 = vsub.f32 %v2846_v2, %v1211_v49 }
 0x39b   :  { %2532 = vpow2.f32 %v1271_v47 }
 0x39c   :  { %v1273_v52 = vmul.f32 1.442695, %v1251_v50  ;;  %v1269_v55 = vmul.f32 1.442695, %v1249_v51 }
 0x39d   :  { %v1232_v57 = vpop.xlane.xlu0 %1231  ;;  %v1226_v58 = vpop.xlane.xlu1 %1225 }
 0x39e   :  { %2534 = vpow2.f32 %v1273_v52  ;;  %v1256_v60 = vsub.f32 %v2852_v5, %v1232_v57  ;;  %v1254_v61 = vsub.f32 %v2854_v6, %v1226_v58 }
 0x39f   :  { %v2919_v62 = vpop.eup %2526  ;;  %2536 = vpow2.f32 %v1269_v55 }
 0x3a0   :  { %v1283_v63 = vmul.f32 1.442695, %v1256_v60  ;;  %v1279_v0 = vmul.f32 1.442695, %v1254_v61  ;;  %v1302_v1 = vsel %vm45_vm1, %v2919_v62, 0.0 }
 0x3a1   :  { %v1229_v3 = vpop.xlane.xlu0 %1228  ;;  %1303 = vadd.xlane.f32.xlu0 %v1302_v1  ;;  %v1223_v2 = vpop.xlane.xlu1 %1222 }
 0x3a2   :  { %2538 = vpow2.f32 %v1283_v63  ;;  %v1255_v4 = vsub.f32 %v2858_v8, %v1229_v3  ;;  %v1253_v7 = vsub.f32 %v2862_v10, %v1223_v2 }
 0x3a3   :  { %v2925_v9 = vpop.eup %2528  ;;  %2540 = vpow2.f32 %v1279_v0 }
 0x3a4   :  { %v1281_v5 = vmul.f32 1.442695, %v1255_v4  ;;  %v1277_v6 = vmul.f32 1.442695, %v1253_v7  ;;  %v1299_v11 = vsel %vm45_vm1, %v2925_v9, 0.0 }
 0x3a5   :  { %1300 = vadd.xlane.f32.xlu0 %v1299_v11 }
 0x3a6   :  { %2542 = vpow2.f32 %v1281_v5 }
 0x3a7   :  { %v2929_v12 = vpop.eup %2530  ;;  %2544 = vpow2.f32 %v1277_v6 }
 0x3a8   :  { %v2931_v14 = vpop.eup %2532  ;;  %v1314_v8 = vsel %vm45_vm1, %v2929_v12, 0.0 }
 0x3a9   :  { %1315 = vadd.xlane.f32.xlu0 %v1314_v8  ;;  %v1308_v10 = vsel %vm45_vm1, %v2931_v14, 0.0 }
 0x3aa   :  { %1309 = vadd.xlane.f32.xlu1 %v1308_v10 }
 0x3ab   :  { %v2937_v17 = vpop.eup %2534 }
 0x3ac   :  { %v2939_v18 = vpop.eup %2536  ;;  %v1311_v20 = vsel %vm45_vm1, %v2937_v17, 0.0 }
 0x3ad   :  { %v1244_v21 = vpop.xlane.xlu0 %1243  ;;  %1312 = vadd.xlane.f32.xlu0 %v1311_v20  ;;  %v1305_v22 = vsel %vm45_vm1, %v2939_v18, 0.0 }
 0x3ae   :  { %v1260_v23 = vsub.f32 %v2868_v13, %v1244_v21  ;;  %1306 = vadd.xlane.f32.xlu1 %v1305_v22 }
 0x3af   :  { %v2946_v24 = vpop.eup %2538 }
 0x3b0   :  { %v2948_v25 = vpop.eup %2540  ;;  %v1291_v26 = vmul.f32 1.442695, %v1260_v23  ;;  %v1326_v27 = vsel %vm45_vm1, %v2946_v24, 0.0 }
 0x3b1   :  { %1327 = vadd.xlane.f32.xlu0 %v1326_v27  ;;  %v1241_v28 = vpop.xlane.xlu0 %1240  ;;  %v1320_v29 = vsel %vm45_vm1, %v2948_v25, 0.0  ;;  %v1238_v30 = vpop.xlane.xlu1 %1237 }
 0x3b2   :  { %2546 = vpow2.f32 %v1291_v26  ;;  %v1259_v32 = vsub.f32 %v2872_v15, %v1241_v28  ;;  %1321 = vadd.xlane.f32.xlu1 %v1320_v29  ;;  %v1258_v13 = vsub.f32 %v2874_v16, %v1238_v30 }
 0x3b3   :  { %v2956_v34 = vpop.eup %2542 }
 0x3b4   :  { %v2958_v36 = vpop.eup %2544  ;;  %v1289_v37 = vmul.f32 1.442695, %v1259_v32  ;;  %v1287_v38 = vmul.f32 1.442695, %v1258_v13  ;;  %v1323_v39 = vsel %vm45_vm1, %v2956_v34, 0.0 }
 0x3b5   :  { %1324 = vadd.xlane.f32.xlu0 %v1323_v39  ;;  %v1317_v40 = vsel %vm45_vm1, %v2958_v36, 0.0  ;;  %v1235_v41 = vpop.xlane.xlu1 %1234 }
 0x3b6   :  { %2548 = vpow2.f32 %v1289_v37  ;;  %1318 = vadd.xlane.f32.xlu1 %v1317_v40  ;;  %v1257_v15 = vsub.f32 %v2880_v19, %v1235_v41 }
 0x3b7   :  { %2550 = vpow2.f32 %v1287_v38 }
 0x3b8   :  { %v1285_v16 = vmul.f32 1.442695, %v1257_v15 }
 0x3b9   :  { %v374_v49 = vpop.permute.xlu1 %373  ;;  %v379_v50 = vpop.permute.xlu0 %378 }
 0x3ba   :  { %2552 = vpow2.f32 %v1285_v16  ;;  %v475_v52 = vadd.f32 %v2820_v53, %v379_v50  ;;  %v470_v55 = vadd.f32 %v2822_v54, %v374_v49 }
 0x3bd   :  { %v389_v51 = vpop.permute.xlu1 %388 }
 0x3be   :  { %v2986_v57 = vadd.f32 %v2826_v56, %v389_v51 }
 0x3bf   :  { %v2965_v42 = vpop.eup %2546 }
 0x3c0   :  { %v1338_v43 = vsel %vm45_vm1, %v2965_v42, 0.0 }
 0x3c1   :  { %1339 = vadd.xlane.f32.xlu0 %v1338_v43  ;;  %v384_v58 = vpop.permute.xlu1 %383 }
 0x3c2   :  { %v2991_v60 = vadd.f32 %v2832_v59, %v384_v58 }
 0x3c3   :  { %v2969_v44 = vpop.eup %2548 }
 0x3c4   :  { %v2971_v45 = vpop.eup %2550  ;;  %v1335_v46 = vsel %vm45_vm1, %v2969_v44, 0.0 }
 0x3c5   :  { %1336 = vadd.xlane.f32.xlu0 %v1335_v46  ;;  %v1332_v19 = vsel %vm45_vm1, %v2971_v45, 0.0 }
 0x3c6   :  { %1333 = vadd.xlane.f32.xlu1 %v1332_v19 }
 0x3c7   :  { %v2977_v47 = vpop.eup %2552 }
 0x3c8   :  { %v1329_v48 = vsel %vm45_vm1, %v2977_v47, 0.0 }
 0x3ca   :  { %1330 = vadd.xlane.f32.xlu1 %v1329_v48 }
 0x3db   :  { %1689 = vrot.lane.b32.xlu1 %v470_v55, %s2588_s2  ;;  %1769 = vrot.lane.b32.xlu0 %v475_v52, %s2588_s2 }
 0x3df   :  { %1929 = vrot.lane.b32.xlu1 %v2986_v57, %s2588_s2 }
 0x3e3   :  { %1849 = vrot.lane.b32.xlu1 %v2991_v60, %s2588_s2 }
 0x3e6   :  { %v1295_v53 = vpop.xlane.xlu0 %1294 }
 0x3f2   :  { %v1298_v61 = vpop.xlane.xlu1 %1297 }
 0x3f3   :  { %2554 = vrcp.f32 %v1298_v61 }
 0x3f4   :  { %2556 = vrcp.f32 %v1295_v53 }
 0x400   :  { %v2555_v54 = vpop.eup %2554 }
 0x401   :  { %v1358_v63 = vmul.f32 %v2555_v54, %v2901_v33  ;;  %v2557_v0 = vpop.eup %2556 }
 0x402   :  { %v1357_v56 = vmul.f32 %v2557_v0, %v2897_v31  ;;  %v2269_v0 = vld [vmem:[%s3138_s4 + $0x60] sm:$0xff] }
 0x403   :  { %2444 = vmatpush3.xpose.msk.msra.mxu0 %vm45_vm1, %v1358_v63 }
 0x404   :  { %2445 = vmatprep.subr.mxu0 %v2591_v35 }
 0x407   :  { %2446 = vmatpush3.xpose.msk.msra.mxu0 %vm45_vm1, %v1357_v56 }
 0x408   :  { %2457 = vmatprep.subr.mxu0 %v2591_v35 }
 0x40a   :  { %2448 = vmatmul.mubr.msk.f32.vlgmr.msra.gmra.mxu0 %vm45_vm1, %v470_v55 }
 0x40b   :  { %2461 = vmatprep.mubr.msk.f32.mxu0 %vm2592_vm3, %v2591_v35 }
 0x42a   :  { %v1304_v59 = vpop.xlane.xlu0 %1303 }
 0x42b   :  { %2558 = vrcp.f32 %v1304_v59  ;;  %v2271_v59 = vld [vmem:[%s3138_s4 + $0x70] sm:$0xff] }
 0x42e   :  { %v1301_v1 = vpop.xlane.xlu0 %1300 }
 0x42f   :  { %2560 = vrcp.f32 %v1301_v1  ;;  %v2270_v1 = vld [vmem:[%s3138_s4 + $0x68] sm:$0xff] }
 0x432   :  { %v1316_v33 = vpop.xlane.xlu0 %1315 }
 0x433   :  { %2562 = vrcp.f32 %v1316_v33  ;;  %v1310_v3 = vpop.xlane.xlu1 %1309  ;;  %v2272_v33 = vld [vmem:[%s3138_s4 + $0x78] sm:$0xff] }
 0x434   :  { %2564 = vrcp.f32 %v1310_v3 }
 0x436   :  { %v1313_v2 = vpop.xlane.xlu0 %1312 }
 0x437   :  { %2566 = vrcp.f32 %v1313_v2  ;;  %v1307_v31 = vpop.xlane.xlu1 %1306 }
 0x438   :  { %v2559_v4 = vpop.eup %2558  ;;  %2568 = vrcp.f32 %v1307_v31 }
 0x439   :  { %v1360_v7 = vmul.f32 %v2559_v4, %v2919_v62 }
 0x43a   :  { %v1328_v5 = vpop.xlane.xlu0 %1327 }
 0x43b   :  { %2570 = vrcp.f32 %v1328_v5  ;;  %v1322_v6 = vpop.xlane.xlu1 %1321  ;;  %2451 = vmatpush3.xpose.msk.msra.mxu1 %vm45_vm1, %v1360_v7 }
 0x43c   :  { %v2561_v11 = vpop.eup %2560  ;;  %2572 = vrcp.f32 %v1322_v6  ;;  %2452 = vmatprep.subr.mxu1 %v2591_v35 }
 0x43d   :  { %v1359_v8 = vmul.f32 %v2561_v11, %v2925_v9 }
 0x43e   :  { %v1325_v10 = vpop.xlane.xlu0 %1324 }
 0x43f   :  { %2574 = vrcp.f32 %v1325_v10  ;;  %v1319_v20 = vpop.xlane.xlu1 %1318  ;;  %2453 = vmatpush3.xpose.msk.msra.mxu1 %vm45_vm1, %v1359_v8  ;;  %v2266_v8 = vld [vmem:[%s3136_s3 + $0x68] sm:$0xff]  ;;  %v2267_v10 = vld [vmem:[%s3136_s3 + $0x70] sm:$0xff] }
 0x440   :  { %v2563_v21 = vpop.eup %2562  ;;  %2576 = vrcp.f32 %v1319_v20  ;;  %2464 = vmatprep.subr.mxu1 %v2591_v35  ;;  %v2268_v20 = vld [vmem:[%s3136_s3 + $0x78] sm:$0xff] }
 0x441   :  { %v2565_v62 = vpop.eup %2564  ;;  %v1364_v22 = vmul.f32 %v2563_v21, %v2929_v12 }
 0x442   :  { %2455 = vmatmul.mubr.msk.f32.vlgmr.msra.gmra.mxu1 %vm45_vm1, %v475_v52  ;;  %v1362_v23 = vmul.f32 %v2565_v62, %v2931_v14 }
 0x443   :  { %2465 = vmatpush3.xpose.msk.msra.mxu1 %vm45_vm1, %v1364_v22  ;;  %2468 = vmatprep.mubr.msk.f32.mxu1 %vm2592_vm3, %v2591_v35 }
 0x444   :  { %v2567_v9 = vpop.eup %2566  ;;  %2458 = vmatpush3.xpose.msk.msra.mxu0 %vm45_vm1, %v1362_v23  ;;  %2466 = vmatprep.subr.mxu1 %v2591_v35 }
 0x445   :  { %v2569_v26 = vpop.eup %2568  ;;  %2459 = vmatprep.subr.mxu0 %v2591_v35  ;;  %v1363_v27 = vmul.f32 %v2567_v9, %v2937_v17 }
 0x446   :  { %v1361_v12 = vmul.f32 %v2569_v26, %v2939_v18 }
 0x447   :  { %2467 = vmatpush3.xpose.msk.msra.mxu1 %vm45_vm1, %v1363_v27 }
 0x448   :  { %v2571_v14 = vpop.eup %2570  ;;  %2460 = vmatpush3.xpose.msk.msra.mxu0 %vm45_vm1, %v1361_v12  ;;  %2478 = vmatprep.subr.mxu1 %v2591_v35 }
 0x449   :  { %v2573_v28 = vpop.eup %2572  ;;  %2471 = vmatprep.subr.mxu0 %v2591_v35  ;;  %v1368_v29 = vmul.f32 %v2571_v14, %v2946_v24 }
 0x44a   :  { %v1340_v30 = vpop.xlane.xlu0 %1339  ;;  %2469 = vmatmul.mubr.msk.f32.vlgmr.msra.gmra.mxu1 %vm45_vm1, %v2986_v57  ;;  %v1366_v17 = vmul.f32 %v2573_v28, %v2948_v25 }
 0x44b   :  { %2578 = vrcp.f32 %v1340_v30  ;;  %2462 = vmatmul.mubr.msk.f32.vlgmr.msra.gmra.mxu0 %vm45_vm1, %v2991_v60  ;;  %2479 = vmatpush3.xpose.msk.msra.mxu1 %vm45_vm1, %v1368_v29 }
 0x44c   :  { %v2575_v18 = vpop.eup %2574  ;;  %2472 = vmatpush3.xpose.msk.msra.mxu0 %vm45_vm1, %v1366_v17  ;;  %2480 = vmatprep.subr.mxu1 %v2591_v35 }
 0x44d   :  { %v2577_v32 = vpop.eup %2576  ;;  %2473 = vmatprep.subr.mxu0 %v2591_v35  ;;  %v1367_v24 = vmul.f32 %v2575_v18, %v2956_v34  ;;  %2482 = vmatprep.mubr.msk.f32.mxu1 %vm2592_vm3, %v2591_v35 }
 0x44e   :  { %v1337_v25 = vpop.xlane.xlu0 %1336  ;;  %v1365_v13 = vmul.f32 %v2577_v32, %v2958_v36  ;;  %2475 = vmatprep.mubr.msk.f32.mxu0 %vm2592_vm3, %v2591_v35 }
 0x44f   :  { %2580 = vrcp.f32 %v1337_v25  ;;  %v1334_v37 = vpop.xlane.xlu1 %1333  ;;  %2481 = vmatpush3.xpose.msk.msra.mxu1 %vm45_vm1, %v1367_v24 }
 0x450   :  { %2582 = vrcp.f32 %v1334_v37  ;;  %2474 = vmatpush3.xpose.msk.msra.mxu0 %vm45_vm1, %v1365_v13  ;;  %2492 = vmatprep.subr.mxu1 %v2591_v35 }
 0x451   :  { %2485 = vmatprep.subr.mxu0 %v2591_v35 }
 0x452   :  { %v1770_v34 = vpop.permute.xlu0 %1769 }
 0x453   :  { %v1331_v38 = vpop.xlane.xlu1 %1330  ;;  %2483 = vmatmul.mubr.msk.f32.vlgmr.msra.gmra.mxu1 %vm45_vm1, %v1770_v34 }
 0x454   :  { %2584 = vrcp.f32 %v1331_v38  ;;  %2496 = vmatprep.mubr.msk.f32.mxu1 %vm2592_vm3, %v2591_v35 }
 0x457   :  { %v1690_v36 = vpop.permute.xlu1 %1689 }
 0x458   :  { %v2579_v39 = vpop.eup %2578  ;;  %2476 = vmatmul.mubr.msk.f32.vlgmr.msra.gmra.mxu0 %vm45_vm1, %v1690_v36 }
 0x459   :  { %v1372_v40 = vmul.f32 %v2579_v39, %v2965_v42  ;;  %2489 = vmatprep.mubr.msk.f32.mxu0 %vm2592_vm3, %v2591_v35 }
 0x45b   :  { %2493 = vmatpush3.xpose.msk.msra.mxu1 %vm45_vm1, %v1372_v40  ;;  %v1930_v46 = vpop.permute.xlu1 %1929 }
 0x45c   :  { %v2581_v41 = vpop.eup %2580  ;;  %2494 = vmatprep.subr.mxu1 %v2591_v35 }
 0x45d   :  { %v2583_v15 = vpop.eup %2582  ;;  %v1371_v16 = vmul.f32 %v2581_v41, %v2969_v44 }
 0x45e   :  { %v1370_v43 = vmul.f32 %v2583_v15, %v2971_v45 }
 0x45f   :  { %2495 = vmatpush3.xpose.msk.msra.mxu1 %vm45_vm1, %v1371_v16  ;;  %v1850_v48 = vpop.permute.xlu1 %1849 }
 0x460   :  { %2486 = vmatpush3.xpose.msk.msra.mxu0 %vm45_vm1, %v1370_v43 }
 0x461   :  { %v2585_v19 = vpop.eup %2584  ;;  %2487 = vmatprep.subr.mxu0 %v2591_v35 }
 0x462   :  { %2497 = vmatmul.mubr.msk.f32.vlgmr.msra.gmra.mxu1 %vm45_vm1, %v1930_v46  ;;  %v1369_v42 = vmul.f32 %v2585_v19, %v2977_v47  ;;  %v2265_v47 = vld [vmem:[%s3136_s3 + $0x60] sm:$0xff] }
 0x464   :  { %2488 = vmatpush3.xpose.msk.msra.mxu0 %vm45_vm1, %v1369_v42 }
 0x467   :  { %2490 = vmatmul.mubr.msk.f32.vlgmr.msra.gmra.mxu0 %vm45_vm1, %v1850_v48 }
 0x468   :  { %2507 = vmatprep.mubr.msk.f32.mxu0 %vm136_vm0, %v2265_v47 }
 0x4ca   :  { %v1448_v44 = vpop.f32.mrf.mxu0 }
 0x4cc   :  { %v2449_v49 = vpop.f32.mrf.mxu0 }
 0x502   :  { %v1527_v45 = vpop.f32.mrf.mxu1 }
 0x504   :  { %v2456_v50 = vpop.f32.mrf.mxu1 }
 0x50a   :  { %v1685_v51 = vpop.f32.mrf.mxu1 }
 0x50b   :  { %v1606_v52 = vpop.f32.mrf.mxu0 }
 0x50c   :  { %v2470_v55 = vpop.f32.mrf.mxu1 }
 0x50d   :  { %v2463_v57 = vpop.f32.mrf.mxu0 }
 0x513   :  { %v1845_v58 = vpop.f32.mrf.mxu1 }
 0x515   :  { %v2484_v60 = vpop.f32.mrf.mxu1 }
 0x518   :  { %v1765_v35 = vpop.f32.mrf.mxu0 }
 0x51a   :  { %v2477_v53 = vpop.f32.mrf.mxu0 }
 0x522   :  { %v2005_v61 = vpop.f32.mrf.mxu1 }
 0x523   :  { %2019 = vrot.lane.b32.xlu0 %v2005_v61, %s2586_s22 }
 0x524   :  { %v2498_v54 = vpop.f32.mrf.mxu1 }
 0x527   :  { %v1925_v63 = vpop.f32.mrf.mxu0  ;;  %2015 = vrot.lane.b32.xlu0 %v1845_v58, %s2586_s22 }
 0x528   :  { %2017 = vrot.lane.b32.xlu1 %v1925_v63, %s2586_s22 }
 0x529   :  { %v2491_v56 = vpop.f32.mrf.mxu0 }
 0x52b   :  { %2041 = vperm.xlu0 %2520, %v2269_v0  }
 0x52c   :  { %2013 = vrot.lane.b32.xlu1 %v1765_v35, %s2586_s22 }
 0x52f   :  { %2051 = vperm.xlu0 %2520, %v2271_v59  }
 0x530   :  { %2046 = vperm.xlu1 %2521, %v2270_v1  }
 0x534   :  { %2056 = vperm.xlu1 %2521, %v2272_v33  }
 0x595   :  { %v2020_v3 = vpop.permute.xlu0 %2019 }
 0x596   :  { %v2028_v2 = vsel %vm45_vm1, %v1685_v51, %v2020_v3 }
 0x597   :  { %2499 = vmatprep.subr.mxu0 %v2028_v2 }
 0x598   :  { %2500 = vmatpush3.msra.mxu0 %v2028_v2 }
 0x599   :  { %v2016_v31 = vpop.permute.xlu0 %2015 }
 0x59a   :  { %v2018_v4 = vpop.permute.xlu1 %2017  ;;  %v2026_v5 = vsel %vm45_vm1, %v1527_v45, %v2016_v31 }
 0x59b   :  { %v2027_v7 = vsel %vm45_vm1, %v1606_v52, %v2018_v4 }
 0x59c   :  { %2501 = vmatprep.subr.mxu0 %v2027_v7 }
 0x59d   :  { %2502 = vmatpush3.msra.mxu0 %v2027_v7 }
 0x59e   :  { %2503 = vmatprep.subr.mxu0 %v2026_v5  ;;  %v2014_v6 = vpop.permute.xlu1 %2013 }
 0x59f   :  { %2504 = vmatpush3.msra.mxu0 %v2026_v5  ;;  %v2025_v11 = vsel %vm45_vm1, %v1448_v44, %v2014_v6 }
 0x5a0   :  { %2505 = vmatprep.subr.mxu0 %v2025_v11 }
 0x5a1   :  { %2506 = vmatpush3.msra.mxu0 %v2025_v11 }
 0x5a2   :  { %2508 = vmatmul.mubr.msk.f32.vlgmr.msra.gmra.mxu0 %vm136_vm0, %v2266_v8 }
 0x5a3   :  { %2510 = vmatprep.mubr.msk.f32.mxu0 %vm136_vm0, %v2267_v10 }
 0x5a6   :  { %2511 = vmatmul.mubr.msk.f32.gmra.mxu0 %vm136_vm0, %v2268_v20  ;;  %v2042_v62 = vpop.permute.xlu0 %2041 }
 0x5aa   :  { %v2052_v28 = vpop.permute.xlu0 %2051 }
 0x5ab   :  { %v2047_v21 = vpop.permute.xlu1 %2046 }
 0x5af   :  { %v2057_v27 = vpop.permute.xlu1 %2056 }
 0x662   :  { %v2509_v22 = vpop.f32.mrf.mxu0 }
 0x663   :  { %v2143_v23 = vadd.f32 %v2509_v22, %v2047_v21 }
 0x664   :  { %v2137_v9 = vpop.f32.mrf.mxu0 }
 0x665   :  { %2157 = vst.msk [vmem:[%s3140_s5 + $0x8] sm:$0xff] %vm45_vm1, %v2143_v23  ;;  %v2138_v26 = vadd.f32 %v2137_v9, %v2042_v62  ;;  %2166 = vrot.lane.b32.xlu1 %v2143_v23, %s2588_s2 }
 0x666   :  { %v2512_v12 = vpop.f32.mrf.mxu0 }
 0x667   :  { %2156 = vst.msk [vmem:[%s3140_s5] sm:$0xff] %vm45_vm1, %v2138_v26  ;;  %v2153_v14 = vadd.f32 %v2512_v12, %v2057_v27  ;;  %2164 = vrot.lane.b32.xlu0 %v2138_v26, %s2588_s2 }
 0x668   :  { %v2147_v29 = vpop.f32.mrf.mxu0 }
 0x669   :  { %2159 = vst.msk [vmem:[%s3140_s5 + $0x18] sm:$0xff] %vm45_vm1, %v2153_v14  ;;  %v2148_v30 = vadd.f32 %v2147_v29, %v2052_v28  ;;  %2170 = vrot.lane.b32.xlu1 %v2153_v14, %s2588_s2 }
 0x66b   :  { %2158 = vst.msk [vmem:[%s3140_s5 + $0x10] sm:$0xff] %vm45_vm1, %v2148_v30  ;;  %2168 = vrot.lane.b32.xlu0 %v2148_v30, %s2588_s2 }
 0x6d7   :  { %v2167_v17 = vpop.permute.xlu1 %2166 }
 0x6d8   :  { %2278 = vst.msk [vmem:[%s3140_s5 + $0x28] sm:$0xff] %vm45_vm1, %v2167_v17 }
 0x6d9   :  { %v2165_v18 = vpop.permute.xlu0 %2164 }
 0x6da   :  { %2277 = vst.msk [vmem:[%s3140_s5 + $0x20] sm:$0xff] %vm45_vm1, %v2165_v18 }
 0x6db   :  { %v2171_v32 = vpop.permute.xlu1 %2170 }
 0x6dc   :  { %2280 = vst.msk [vmem:[%s3140_s5 + $0x38] sm:$0xff] %vm45_vm1, %v2171_v32 }
 0x6dd   :  { %v2169_v24 = vpop.permute.xlu0 %2168 }
 0x6de   :  { %2279 = vst.msk [vmem:[%s3140_s5 + $0x30] sm:$0xff] %vm45_vm1, %v2169_v24 }

</bundles_post_ra>
